<compile_context>
chip_gen: v7x
topology: tpu7x:2x2x1
jax: 0.10.0
libtpu: 0.0.40
codegen_flags: <defaults>
</compile_context>

<pallas_src>
import jax
import jax.numpy as jnp
from jax.experimental import pallas as pl
from jax.experimental.pallas import tpu as pltpu

NB_CLASSES = 20
LANE = 128   # TPU lane width — class dim is padded to this for dense stores


def mlp_kernel(x_ref, w1_ref, b1_ref, w2_ref, b2_ref, o_ref):
    # fc1: (TB, F)bf16 @ (F, H)bf16 -> f32 on the MXU; bias + ReLU in f32 (VPU).
    h = jnp.dot(x_ref[...], w1_ref[...], preferred_element_type=jnp.float32)
    h = jnp.maximum(h + b1_ref[...], 0.0)
    # fc2: cast back to bf16 so the second MXU push also runs at bf16 rate.
    h = h.astype(w2_ref.dtype)
    # (TB, H) @ (H, C_pad) + (1, C_pad); C_pad = 128 -> lane-dense store.
    o_ref[...] = (
        jnp.dot(h, w2_ref[...], preferred_element_type=jnp.float32)
        + b2_ref[...]
    )


def prepare_params(w1, b1, w2, b2):
    """One-time parameter prep, hoisted out of the per-call hot path:
    cast weights to bf16 and zero-pad the class dim to a full lane (128)."""
    h, c = w2.shape
    c_pad = max(LANE, ((c + LANE - 1) // LANE) * LANE)
    w1_p = w1.astype(jnp.bfloat16)
    b1_p = b1.reshape(1, -1).astype(jnp.float32)
    w2_p = jnp.zeros((h, c_pad), jnp.bfloat16).at[:, :c].set(w2.astype(jnp.bfloat16))
    b2_p = jnp.zeros((1, c_pad), jnp.float32).at[:, :c].set(
        b2.reshape(1, -1).astype(jnp.float32))
    return w1_p, b1_p, w2_p, b2_p, c


def _choose_batch_tile(B):
    """Pick a batch tile TB that divides B exactly (no pad, no masked tail).
    B <= 512 -> single full-batch step.  Otherwise prefer 2+ parallel steps of
    256..1024 rows (256+ fills the v6e/v7x MXU height; several parallel steps
    let v7x use both TensorCores; <=1024 bounds VMEM per step)."""
    if B <= 512:
        return B, 1
    for n in range(2, B + 1):
        if B % n == 0:
            tb = B // n
            if tb < 256:
                break
            if tb <= 1024 and tb % 8 == 0:
                return tb, n
    # Awkward batch size: single full-batch block (block shape == array shape
    # has no (8,128) divisibility constraint).
    return B, 1


def neural_network_forward(x, w1_p, b1_p, w2_p, b2_p, nb_classes=NB_CLASSES):
    """y = relu(x @ W1 + b1) @ W2 + b2 in one batch-tiled Pallas kernel.
    Expects parameters already prepared by prepare_params()."""
    B, F = x.shape
    H = w1_p.shape[1]
    c_pad = w2_p.shape[1]

    x = x.astype(jnp.bfloat16)            # halves the dominant input DMA bytes
    tb, n_tiles = _choose_batch_tile(B)

    cost = pl.CostEstimate(
        flops=2 * B * (F * H + H * c_pad),
        transcendentals=0,
        bytes_accessed=(x.size * 2 + w1_p.size * 2 + w2_p.size * 2
                        + b1_p.size * 4 + b2_p.size * 4 + B * c_pad * 4),
    )

    out_padded = pl.pallas_call(
        mlp_kernel,
        out_shape=jax.ShapeDtypeStruct((B, c_pad), jnp.float32),
        grid=(n_tiles,),
        in_specs=[
            # x: one (tb, F) tile per grid step (double-buffered by Pallas).
            pl.BlockSpec((tb, F), lambda i: (i, 0)),
            # Weights / biases: same block every step -> resident in VMEM.
            pl.BlockSpec((F, H), lambda i: (0, 0)),
            pl.BlockSpec((1, H), lambda i: (0, 0)),
            pl.BlockSpec((H, c_pad), lambda i: (0, 0)),
            pl.BlockSpec((1, c_pad), lambda i: (0, 0)),
        ],
        out_specs=pl.BlockSpec((tb, c_pad), lambda i: (i, 0)),
        compiler_params=pltpu.CompilerParams(
            # Batch tiles are independent -> parallel (v7x shards across 2 TCs).
            dimension_semantics=("parallel",),
        ),
        cost_estimate=cost,
    )(x, w1_p, b1_p, w2_p, b2_p)

    # TODO(synk): a consumer that tolerates the padded 128-wide f32 output could
    # skip this slice (it is one extra read of the output buffer).
    return out_padded[:, :nb_classes]


if __name__ == "__main__":
    key = jax.random.PRNGKey(0)
    k_x, k_fc1w, k_fc1b, k_fc2w, k_fc2b = jax.random.split(key, 5)

    # Shapes consistent with the module: nb_colonnes=32 features, hidden=128,
    # nb_classes=20.  B=256 -> single full-batch grid step (no padding).
    B = 256
    NB_COLONNES = 32
    HIDDEN = 128

    # Synthetic tabular input, normalized with global mean/std like the script.
    x_raw = jax.random.normal(k_x, (B, NB_COLONNES), jnp.float32) * 3.0 + 1.5
    x = (x_raw - x_raw.mean()) / x_raw.std()

    # Deterministic init mimicking torch.nn.Linear default U(-1/sqrt(fan_in), ..).
    def init_linear(kw, kb, fan_in, fan_out):
        bound = 1.0 / jnp.sqrt(jnp.float32(fan_in))
        w = jax.random.uniform(kw, (fan_in, fan_out), jnp.float32, -bound, bound)
        b = jax.random.uniform(kb, (fan_out,), jnp.float32, -bound, bound)
        return w, b

    w1, b1 = init_linear(k_fc1w, k_fc1b, NB_COLONNES, HIDDEN)
    w2, b2 = init_linear(k_fc2w, k_fc2b, HIDDEN, NB_CLASSES)

    # One-time parameter prep (bf16 cast + class-dim pad) — out of the hot path.
    w1_p, b1_p, w2_p, b2_p, _ = prepare_params(w1, b1, w2, b2)

    out = neural_network_forward(x, w1_p, b1_p, w2_p, b2_p)
    out = jax.block_until_ready(out)

    # Reference mirroring the kernel numerics (bf16 MXU operands, f32 accumulate).
    x_b = x.astype(jnp.bfloat16).astype(jnp.float32)
    w1_b = w1.astype(jnp.bfloat16).astype(jnp.float32)
    w2_b = w2.astype(jnp.bfloat16).astype(jnp.float32)
    h_ref = jnp.maximum(x_b @ w1_b + b1, 0.0)
    ref = h_ref.astype(jnp.bfloat16).astype(jnp.float32) @ w2_b + b2

    assert out.shape == (B, NB_CLASSES)
    assert jnp.allclose(out, ref, atol=1e-2, rtol=1e-2), float(
        jnp.max(jnp.abs(out - ref)))

    print("KERNEL_OK")
</pallas_src>

<mosaic_0001>
module attributes {stable_mosaic.version = 11 : i64} {
  func.func @mlp_kernel(%arg0: i32, %arg1: memref<256x32xbf16, #tpu.memory_space<vmem>>, %arg2: memref<32x128xbf16, #tpu.memory_space<vmem>>, %arg3: memref<1x128xf32, #tpu.memory_space<vmem>>, %arg4: memref<128x128xbf16, #tpu.memory_space<vmem>>, %arg5: memref<1x128xf32, #tpu.memory_space<vmem>>, %arg6: memref<256x128xf32, #tpu.memory_space<vmem>>) attributes {dimension_semantics = [#tpu.dimension_semantics<parallel>], iteration_bounds = array<i64: 1>, scalar_prefetch = 0 : i64, scratch_operands = 0 : i64, tpu.core_type = #tpu.core_type<tc>, window_params = [{transform_indices = @transform_0, window_bounds = array<i64: 256, 32>}, {pipeline_mode = #tpu.pipeline_mode<synchronous>, transform_indices = @transform_1, window_bounds = array<i64: 32, 128>}, {pipeline_mode = #tpu.pipeline_mode<synchronous>, transform_indices = @transform_2, window_bounds = array<i64: 1, 128>}, {pipeline_mode = #tpu.pipeline_mode<synchronous>, transform_indices = @transform_3, window_bounds = array<i64: 128, 128>}, {pipeline_mode = #tpu.pipeline_mode<synchronous>, transform_indices = @transform_4, window_bounds = array<i64: 1, 128>}, {transform_indices = @transform_5, window_bounds = array<i64: 256, 128>}]} {
    %c0 = arith.constant 0 : index
    %c0_0 = arith.constant 0 : index
    %0 = vector.load %arg1[%c0, %c0_0] : memref<256x32xbf16, #tpu.memory_space<vmem>>, vector<256x32xbf16>
    %c0_1 = arith.constant 0 : index
    %c0_2 = arith.constant 0 : index
    %1 = vector.load %arg2[%c0_1, %c0_2] : memref<32x128xbf16, #tpu.memory_space<vmem>>, vector<32x128xbf16>
    %cst = arith.constant dense<0.000000e+00> : vector<256x128xf32>
    %2 = tpu.matmul %0, %1, %cst {dimension_numbers = #tpu.dot_dimension_numbers<[1], [0], [0], [1], [0, 0, 1, 1], [], []>} : vector<256x32xbf16>, vector<32x128xbf16>, vector<256x128xf32> -> vector<256x128xf32>
    %c0_3 = arith.constant 0 : index
    %c0_4 = arith.constant 0 : index
    %3 = vector.load %arg3[%c0_3, %c0_4] : memref<1x128xf32, #tpu.memory_space<vmem>>, vector<1x128xf32>
    %4 = vector.broadcast %3 : vector<1x128xf32> to vector<256x128xf32>
    %5 = arith.addf %2, %4 : vector<256x128xf32>
    %cst_5 = arith.constant 0.000000e+00 : f32
    %6 = vector.broadcast %cst_5 : f32 to vector<256x128xf32>
    %7 = arith.maximumf %5, %6 : vector<256x128xf32>
    %8 = arith.truncf %7 : vector<256x128xf32> to vector<256x128xbf16>
    %c0_6 = arith.constant 0 : index
    %c0_7 = arith.constant 0 : index
    %9 = vector.load %arg4[%c0_6, %c0_7] : memref<128x128xbf16, #tpu.memory_space<vmem>>, vector<128x128xbf16>
    %cst_8 = arith.constant dense<0.000000e+00> : vector<256x128xf32>
    %10 = tpu.matmul %8, %9, %cst_8 {dimension_numbers = #tpu.dot_dimension_numbers<[1], [0], [0], [1], [0, 0, 1, 1], [], []>} : vector<256x128xbf16>, vector<128x128xbf16>, vector<256x128xf32> -> vector<256x128xf32>
    %c0_9 = arith.constant 0 : index
    %c0_10 = arith.constant 0 : index
    %11 = vector.load %arg5[%c0_9, %c0_10] : memref<1x128xf32, #tpu.memory_space<vmem>>, vector<1x128xf32>
    %12 = vector.broadcast %11 : vector<1x128xf32> to vector<256x128xf32>
    %13 = arith.addf %10, %12 : vector<256x128xf32>
    %c0_11 = arith.constant 0 : index
    %c0_12 = arith.constant 0 : index
    %14 = vector.load %arg6[%c0_11, %c0_12] : memref<256x128xf32, #tpu.memory_space<vmem>>, vector<256x128xf32>
    tpu.vector_store %arg6[%c0_11, %c0_12], %13 {strides = array<i32>} : memref<256x128xf32, #tpu.memory_space<vmem>>, vector<256x128xf32>,
    return
  }
  func.func @transform_0(%arg0: i32) -> (i32, i32) {
    %c0_i32 = arith.constant 0 : i32
    %c0_i32_0 = arith.constant 0 : i32
    return %arg0, %c0_i32 : i32, i32
  }
  func.func @transform_1(%arg0: i32) -> (i32, i32) {
    %c0_i32 = arith.constant 0 : i32
    %c0_i32_0 = arith.constant 0 : i32
    %c0_i32_1 = arith.constant 0 : i32
    return %c0_i32, %c0_i32_0 : i32, i32
  }
  func.func @transform_2(%arg0: i32) -> (i32, i32) {
    %c0_i32 = arith.constant 0 : i32
    %c0_i32_0 = arith.constant 0 : i32
    %c0_i32_1 = arith.constant 0 : i32
    return %c0_i32, %c0_i32_0 : i32, i32
  }
  func.func @transform_3(%arg0: i32) -> (i32, i32) {
    %c0_i32 = arith.constant 0 : i32
    %c0_i32_0 = arith.constant 0 : i32
    %c0_i32_1 = arith.constant 0 : i32
    return %c0_i32, %c0_i32_0 : i32, i32
  }
  func.func @transform_4(%arg0: i32) -> (i32, i32) {
    %c0_i32 = arith.constant 0 : i32
    %c0_i32_0 = arith.constant 0 : i32
    %c0_i32_1 = arith.constant 0 : i32
    return %c0_i32, %c0_i32_0 : i32, i32
  }
  func.func @transform_5(%arg0: i32) -> (i32, i32) {
    %c0_i32 = arith.constant 0 : i32
    %c0_i32_0 = arith.constant 0 : i32
    return %arg0, %c0_i32 : i32, i32
  }
}

</mosaic_0001>

<bundles_post_ra>
// kernel: tpu_custom_call.1
= control target key start
LH: loop header
LB: loop body
LE: loop exit
PB: predicated region body
PF: predicated region fallthrough
CT: control target
= control target key end

     0   :  { %vm157_vm0 = vcmask 261120   ;;  %s1147_s0 = inlined_call_operand.vmem [shape: bf16[256,32], index: 0, kind: input, shape index: {}]   ;;  %s1148_s1 = inlined_call_operand.vmem [shape: bf16[32,128], index: 1, kind: input, shape index: {}]   ;;  %s1149_s2 = inlined_call_operand.vmem [shape: f32[1,128], index: 2, kind: input, shape index: {}]   ;;  %s1150_s3 = inlined_call_operand.vmem [shape: bf16[128,128], index: 3, kind: input, shape index: {}]   ;;  %s1151_s4 = inlined_call_operand.vmem [shape: f32[1,128], index: 4, kind: input, shape index: {}]   ;;  %s1152_s5 = inlined_call_operand.hbm [shape: f32[256,128], index: 5, kind: output, shape index: {}]  }
   0x1   :  { %v884_v0 = vld [vmem:[%s1148_s1] sm:$0xff]   ;;  %v885_v1 = vld [vmem:[%s1148_s1 + $0x8] sm:$0xff]   ;;  %v888_v4 = vld [vmem:[%s1147_s0 + $0x10] sm:$0xff]  }
   0x2   :  { %781 = vmatprep.subr.bf16.mxu0 %v884_v0  ;;  %v886_v2 = vld [vmem:[%s1147_s0] sm:$0xff]   ;;  %v887_v3 = vld [vmem:[%s1147_s0 + $0x8] sm:$0xff]   ;;  %v889_v5 = vld [vmem:[%s1147_s0 + $0x18] sm:$0xff]  }
   0x3   :  { %782 = vmatpush3.bf16.msra.mxu0 %v884_v0  ;;  %785 = vmatprep.mubr.msk.bf16.mxu0 %vm157_vm0, %v886_v2  ;;  %v890_v6 = vld [vmem:[%s1147_s0 + $0x20] sm:$0xff]   ;;  %v903_v8 = vld [vmem:[%s1150_s3 + $0x8] sm:$0xff]   ;;  %v904_v10 = vld [vmem:[%s1150_s3 + $0x10] sm:$0xff]  }
   0x4   :  { %783 = vmatprep.subr.bf16.mxu0 %v885_v1  ;;  %v902_v7 = vld [vmem:[%s1150_s3] sm:$0xff]   ;;  %v891_v9 = vld [vmem:[%s1147_s0 + $0x28] sm:$0xff]   ;;  %v892_v11 = vld [vmem:[%s1147_s0 + $0x30] sm:$0xff]  }
   0x5   :  { %865 = vmatprep.subr.bf16.mxu1 %v902_v7 }
   0x6   :  { %873 = vmatpush3.bf16.msra.mxu1 %v902_v7 }
   0x7   :  { %784 = vmatpush3.bf16.msra.mxu0 %v885_v1  ;;  %866 = vmatprep.subr.bf16.mxu1 %v903_v8 }
   0x8   :  { %817 = vmatprep.subr.bf16.mxu0 %v902_v7 }
   0xa   :  { %786 = vmatmul.mubr.msk.bf16.vlgmr.msra.gmra.mrb[0].mxu0 %vm157_vm0, %v887_v3  ;;  %874 = vmatpush3.bf16.msra.mxu1 %v903_v8 }
   0xb   :  { %789 = vmatprep.mubr.msk.bf16.mxu0 %vm157_vm0, %v888_v4  ;;  %818 = vmatpush3.bf16.msra.mxu0 %v902_v7 }
   0xc   :  { %819 = vmatprep.subr.bf16.mxu0 %v903_v8 }
   0xf   :  { %820 = vmatpush3.bf16.msra.mxu0 %v903_v8 }
  0x12   :  { %790 = vmatmul.mubr.msk.bf16.gmra.mrb[4].mxu0 %vm157_vm0, %v889_v5 }
  0x13   :  { %793 = vmatprep.mubr.msk.bf16.mxu0 %vm157_vm0, %v890_v6 }
  0x14   :  { %10 = vsyncpa [#allocation3], 0  ;;  %821 = vmatprep.subr.bf16.mxu0 %v904_v10  ;;  %v905_v12 = vld [vmem:[%s1150_s3 + $0x18] sm:$0xff]   ;;  %867 = vmatprep.subr.bf16.mxu1 %v904_v10  ;;  %v906_v14 = vld [vmem:[%s1150_s3 + $0x20] sm:$0xff]  }
  0x15   :  { %822 = vmatpush3.bf16.msra.mxu0 %v904_v10  ;;  %875 = vmatpush3.bf16.msra.mxu1 %v904_v10  ;;  %v893_v13 = vld [vmem:[%s1147_s0 + $0x38] sm:$0xff]   ;;  %v894_v15 = vld [vmem:[%s1147_s0 + $0x40] sm:$0xff]   ;;  %v907_v16 = vld [vmem:[%s1150_s3 + $0x28] sm:$0xff]  }
  0x16   :  { %823 = vmatprep.subr.bf16.mxu0 %v905_v12  ;;  %868 = vmatprep.subr.bf16.mxu1 %v905_v12  ;;  %v895_v17 = vld [vmem:[%s1147_s0 + $0x48] sm:$0xff]   ;;  %v896_v18 = vld [vmem:[%s1147_s0 + $0x50] sm:$0xff]   ;;  %v897_v19 = vld [vmem:[%s1147_s0 + $0x58] sm:$0xff]  }
  0x17   :  { %v898_v20 = vld [vmem:[%s1147_s0 + $0x60] sm:$0xff]   ;;  %v899_v21 = vld [vmem:[%s1147_s0 + $0x68] sm:$0xff]   ;;  %v900_v22 = vld [vmem:[%s1147_s0 + $0x70] sm:$0xff]  }
  0x18   :  { %v901_v23 = vld [vmem:[%s1147_s0 + $0x78] sm:$0xff]   ;;  %v908_v24 = vld [vmem:[%s1150_s3 + $0x30] sm:$0xff]   ;;  %v1064_v26 = vld [vmem:[%s1149_s2] ss:$0 sm:$0xff] }
  0x19   :  { %824 = vmatpush3.bf16.msra.mxu0 %v905_v12  ;;  %876 = vmatpush3.bf16.msra.mxu1 %v905_v12  ;;  %v909_v25 = vld [vmem:[%s1150_s3 + $0x38] sm:$0xff]  }
  0x1a   :  { %794 = vmatmul.mubr.msk.bf16.gmra.mrb[8].mxu0 %vm157_vm0, %v891_v9  ;;  %825 = vmatprep.subr.bf16.mxu0 %v906_v14 }
  0x1b   :  { %797 = vmatprep.mubr.msk.bf16.mxu0 %vm157_vm0, %v892_v11  ;;  %869 = vmatprep.subr.bf16.mxu1 %v906_v14 }
  0x1d   :  { %826 = vmatpush3.bf16.msra.mxu0 %v906_v14  ;;  %877 = vmatpush3.bf16.msra.mxu1 %v906_v14 }
  0x1e   :  { %827 = vmatprep.subr.bf16.mxu0 %v907_v16  ;;  %870 = vmatprep.subr.bf16.mxu1 %v907_v16 }
  0x21   :  { %828 = vmatpush3.bf16.msra.mxu0 %v907_v16  ;;  %878 = vmatpush3.bf16.msra.mxu1 %v907_v16 }
  0x22   :  { %798 = vmatmul.mubr.msk.bf16.gmra.mrb[12].mxu0 %vm157_vm0, %v893_v13  ;;  %829 = vmatprep.subr.bf16.mxu0 %v908_v24 }
  0x23   :  { %801 = vmatprep.mubr.msk.bf16.mxu0 %vm157_vm0, %v894_v15  ;;  %871 = vmatprep.subr.bf16.mxu1 %v908_v24 }
  0x25   :  { %830 = vmatpush3.bf16.msra.mxu0 %v908_v24  ;;  %879 = vmatpush3.bf16.msra.mxu1 %v908_v24 }
  0x26   :  { %831 = vmatprep.subr.bf16.mxu0 %v909_v25  ;;  %872 = vmatprep.subr.bf16.mxu1 %v909_v25 }
  0x29   :  { %832 = vmatpush3.bf16.msra.mxu0 %v909_v25  ;;  %880 = vmatpush3.bf16.msra.mxu1 %v909_v25 }
  0x2a   :  { %802 = vmatmul.mubr.msk.bf16.gmra.mrb[16].mxu0 %vm157_vm0, %v895_v17 }
  0x2b   :  { %805 = vmatprep.mubr.msk.bf16.mxu0 %vm157_vm0, %v896_v18 }
  0x32   :  { %806 = vmatmul.mubr.msk.bf16.gmra.mrb[20].mxu0 %vm157_vm0, %v897_v19 }
  0x33   :  { %809 = vmatprep.mubr.msk.bf16.mxu0 %vm157_vm0, %v898_v20 }
  0x3a   :  { %810 = vmatmul.mubr.msk.bf16.gmra.mrb[24].mxu0 %vm157_vm0, %v899_v21 }
  0x3b   :  { %813 = vmatprep.mubr.msk.bf16.mxu0 %vm157_vm0, %v900_v22 }
  0x42   :  { %814 = vmatmul.mubr.msk.bf16.gmra.mrb[28].mxu0 %vm157_vm0, %v901_v23 }
  0xdd   :  { %v787_v27 = vpop.f32.mrb[0].mxu0 }
  0xde   :  { %v249_v28 = vadd.f32 %v787_v27, %v1064_v26  ;;  %v240_v29 = vpop.f32.mrb[1].mxu0 }
  0xdf   :  { %v241_v30 = vadd.f32 %v1064_v26, %v240_v29  ;;  %v788_v31 = vpop.f32.mrb[2].mxu0 }
  0xe0   :  { %v252_v32 = vadd.f32 %v788_v31, %v1064_v26  ;;  %v243_v33 = vpop.f32.mrb[3].mxu0  ;;  %v369_v35 = vmax.f32 %v249_v28, 0.0 }
  0xe1   :  { %v244_v34 = vadd.f32 %v1064_v26, %v243_v33  ;;  %v367_v37 = vmax.f32 %v241_v30, 0.0 }
  0xe2   :  { %v370_v36 = vmax.f32 %v252_v32, 0.0 }
  0xe3   :  { %v368_v38 = vmax.f32 %v244_v34, 0.0 }
  0xe4   :  { %v400_v39 = vpack.c.bf16 %v370_v36, %v369_v35 }
  0xe5   :  { %v399_v40 = vpack.c.bf16 %v368_v38, %v367_v37  ;;  %v791_v41 = vpop.f32.mrb[4].mxu0 }
  0xe6   :  { %v265_v42 = vadd.f32 %v791_v41, %v1064_v26  ;;  %v256_v43 = vpop.f32.mrb[5].mxu0 }
  0xe7   :  { %v257_v44 = vadd.f32 %v1064_v26, %v256_v43  ;;  %v792_v45 = vpop.f32.mrb[6].mxu0  ;;  %833 = vmatprep.mubr.bf16.mxu0 %v399_v40 }
  0xe8   :  { %v268_v46 = vadd.f32 %v792_v45, %v1064_v26  ;;  %v259_v47 = vpop.f32.mrb[7].mxu0  ;;  %834 = vmatmul.mubr.bf16.vlgmr.msra.gmra.mrb[32].mxu0 %v400_v39  ;;  %v373_v49 = vmax.f32 %v265_v42, 0.0 }
  0xe9   :  { %v260_v48 = vadd.f32 %v1064_v26, %v259_v47  ;;  %v371_v51 = vmax.f32 %v257_v44, 0.0 }
  0xea   :  { %v374_v50 = vmax.f32 %v268_v46, 0.0 }
  0xeb   :  { %v372_v52 = vmax.f32 %v260_v48, 0.0 }
  0xec   :  { %v402_v53 = vpack.c.bf16 %v374_v50, %v373_v49 }
  0xed   :  { %v795_v54 = vpop.f32.mrb[8].mxu0  ;;  %v401_v55 = vpack.c.bf16 %v372_v52, %v371_v51 }
  0xee   :  { %v281_v56 = vadd.f32 %v795_v54, %v1064_v26  ;;  %v272_v57 = vpop.f32.mrb[9].mxu0 }
  0xef   :  { %v273_v58 = vadd.f32 %v1064_v26, %v272_v57  ;;  %v796_v59 = vpop.f32.mrb[10].mxu0  ;;  %837 = vmatprep.mubr.bf16.mxu1 %v401_v55 }
  0xf0   :  { %v284_v60 = vadd.f32 %v796_v59, %v1064_v26  ;;  %v275_v61 = vpop.f32.mrb[11].mxu0  ;;  %838 = vmatmul.mubr.bf16.vlgmr.msra.gmra.mrb[0].mxu1 %v402_v53  ;;  %v377_v63 = vmax.f32 %v281_v56, 0.0 }
  0xf1   :  { %v276_v62 = vadd.f32 %v1064_v26, %v275_v61  ;;  %v375_v1 = vmax.f32 %v273_v58, 0.0 }
  0xf2   :  { %v378_v0 = vmax.f32 %v284_v60, 0.0 }
  0xf3   :  { %v376_v2 = vmax.f32 %v276_v62, 0.0 }
  0xf4   :  { %v404_v3 = vpack.c.bf16 %v378_v0, %v377_v63 }
  0xf5   :  { %v403_v4 = vpack.c.bf16 %v376_v2, %v375_v1  ;;  %v799_v5 = vpop.f32.mrb[12].mxu0 }
  0xf6   :  { %v297_v6 = vadd.f32 %v799_v5, %v1064_v26  ;;  %v288_v7 = vpop.f32.mrb[13].mxu0 }
  0xf7   :  { %v289_v8 = vadd.f32 %v1064_v26, %v288_v7  ;;  %v800_v9 = vpop.f32.mrb[14].mxu0  ;;  %841 = vmatprep.mubr.bf16.mxu1 %v403_v4 }
  0xf8   :  { %v300_v10 = vadd.f32 %v800_v9, %v1064_v26  ;;  %v291_v11 = vpop.f32.mrb[15].mxu0  ;;  %842 = vmatmul.mubr.bf16.gmra.mrb[4].mxu1 %v404_v3  ;;  %v381_v13 = vmax.f32 %v297_v6, 0.0 }
  0xf9   :  { %v292_v12 = vadd.f32 %v1064_v26, %v291_v11  ;;  %v379_v15 = vmax.f32 %v289_v8, 0.0 }
  0xfa   :  { %v382_v14 = vmax.f32 %v300_v10, 0.0 }
  0xfb   :  { %v380_v16 = vmax.f32 %v292_v12, 0.0  ;;  %v1101_v12 = vld [vmem:[%s1151_s4] ss:$0 sm:$0xff]  ;;  %s934_s4 = smov [#allocation2]  }
  0xfc   :  { %v406_v17 = vpack.c.bf16 %v382_v14, %v381_v13  ;;  %s684_s19 = sshll.u32 %s934_s4, 4  ;;  %s685_s19 = int_to_ptr.vmem [resolvable:$true] %s684_s19 }
  0xfd   :  { %v405_v18 = vpack.c.bf16 %v380_v16, %v379_v15  ;;  %v803_v19 = vpop.f32.mrb[16].mxu0  ;;  %s910_s20 = scalar_lea.vmem %s685_s19, 4096  ;;  %p915_p1 = scmp.lt.s32.totalorder %s685_s19, %s685_s19 }
  0xfe   :  { %v313_v20 = vadd.f32 %v803_v19, %v1064_v26  ;;  %v304_v21 = vpop.f32.mrb[17].mxu0  ;;  %p911_p0 = scmp.ne.s32.totalorder %s685_s19, %s910_s20  ;;  %p916_p2 = scmp.lt.s32.totalorder %s910_s20, %s910_s20 }
  0xff   :  { %v305_v22 = vadd.f32 %v1064_v26, %v304_v21  ;;  %v804_v23 = vpop.f32.mrb[18].mxu0  ;;  %845 = vmatprep.mubr.bf16.mxu1 %v405_v18 }
 0x100   :  { %v316_v24 = vadd.f32 %v804_v23, %v1064_v26  ;;  %v307_v25 = vpop.f32.mrb[19].mxu0  ;;  %846 = vmatmul.mubr.bf16.gmra.mrb[8].mxu1 %v406_v17  ;;  %v385_v28 = vmax.f32 %v313_v20, 0.0  ;;  %p917_p3 = por %p916_p2, %p915_p1 }
 0x101   :  { %v308_v27 = vadd.f32 %v1064_v26, %v307_v25  ;;  %v383_v30 = vmax.f32 %v305_v22, 0.0 }
 0x102   :  { %v386_v29 = vmax.f32 %v316_v24, 0.0  ;;  %p918_p4 = pnand %p917_p3, %p911_p0 }
 0x103   :  { %v384_v31 = vmax.f32 %v308_v27, 0.0 }
 0x104   :  { %v408_v32 = vpack.c.bf16 %v386_v29, %v385_v28 }
 0x105   :  { %v407_v33 = vpack.c.bf16 %v384_v31, %v383_v30  ;;  %v807_v34 = vpop.f32.mrb[20].mxu0 }
 0x106   :  { %v329_v35 = vadd.f32 %v807_v34, %v1064_v26  ;;  %v320_v36 = vpop.f32.mrb[21].mxu0 }
 0x107   :  { %v321_v37 = vadd.f32 %v1064_v26, %v320_v36  ;;  %v808_v38 = vpop.f32.mrb[22].mxu0  ;;  %849 = vmatprep.mubr.bf16.mxu1 %v407_v33 }
 0x108   :  { %v332_v39 = vadd.f32 %v808_v38, %v1064_v26  ;;  %v323_v40 = vpop.f32.mrb[23].mxu0  ;;  %850 = vmatmul.mubr.bf16.gmra.mrb[12].mxu1 %v408_v32  ;;  %v389_v42 = vmax.f32 %v329_v35, 0.0 }
 0x109   :  { %v324_v41 = vadd.f32 %v1064_v26, %v323_v40  ;;  %v387_v44 = vmax.f32 %v321_v37, 0.0 }
 0x10a   :  { %v390_v43 = vmax.f32 %v332_v39, 0.0 }
 0x10b   :  { %v388_v45 = vmax.f32 %v324_v41, 0.0 }
 0x10c   :  { %v410_v46 = vpack.c.bf16 %v390_v43, %v389_v42 }
 0x10d   :  { %v409_v47 = vpack.c.bf16 %v388_v45, %v387_v44  ;;  %v811_v48 = vpop.f32.mrb[24].mxu0 }
 0x10e   :  { %v345_v49 = vadd.f32 %v811_v48, %v1064_v26  ;;  %v336_v50 = vpop.f32.mrb[25].mxu0 }
 0x10f   :  { %v337_v51 = vadd.f32 %v1064_v26, %v336_v50  ;;  %v812_v52 = vpop.f32.mrb[26].mxu0  ;;  %853 = vmatprep.mubr.bf16.mxu1 %v409_v47 }
 0x110   :  { %v348_v53 = vadd.f32 %v812_v52, %v1064_v26  ;;  %v339_v54 = vpop.f32.mrb[27].mxu0  ;;  %854 = vmatmul.mubr.bf16.gmra.mrb[16].mxu1 %v410_v46  ;;  %v393_v56 = vmax.f32 %v345_v49, 0.0 }
 0x111   :  { %v340_v55 = vadd.f32 %v1064_v26, %v339_v54  ;;  %v391_v58 = vmax.f32 %v337_v51, 0.0 }
 0x112   :  { %v394_v57 = vmax.f32 %v348_v53, 0.0 }
 0x113   :  { %v392_v59 = vmax.f32 %v340_v55, 0.0 }
 0x114   :  { %v412_v60 = vpack.c.bf16 %v394_v57, %v393_v56 }
 0x115   :  { %v411_v61 = vpack.c.bf16 %v392_v59, %v391_v58  ;;  %v815_v62 = vpop.f32.mrb[28].mxu0 }
 0x116   :  { %v361_v63 = vadd.f32 %v815_v62, %v1064_v26  ;;  %v352_v0 = vpop.f32.mrb[29].mxu0 }
 0x117   :  { %v353_v1 = vadd.f32 %v1064_v26, %v352_v0  ;;  %v816_v2 = vpop.f32.mrb[30].mxu0  ;;  %857 = vmatprep.mubr.bf16.mxu1 %v411_v61 }
 0x118   :  { %v364_v3 = vadd.f32 %v816_v2, %v1064_v26  ;;  %v355_v4 = vpop.f32.mrb[31].mxu0  ;;  %858 = vmatmul.mubr.bf16.gmra.mrb[20].mxu1 %v412_v60  ;;  %v397_v6 = vmax.f32 %v361_v63, 0.0 }
 0x119   :  { %v356_v5 = vadd.f32 %v1064_v26, %v355_v4  ;;  %v395_v8 = vmax.f32 %v353_v1, 0.0 }
 0x11a   :  { %v398_v7 = vmax.f32 %v364_v3, 0.0 }
 0x11b   :  { %v396_v9 = vmax.f32 %v356_v5, 0.0 }
 0x11c   :  { %v414_v10 = vpack.c.bf16 %v398_v7, %v397_v6 }
 0x11d   :  { %v413_v11 = vpack.c.bf16 %v396_v9, %v395_v8 }
 0x11f   :  { %861 = vmatprep.mubr.bf16.mxu1 %v413_v11 }
 0x120   :  { %862 = vmatmul.mubr.bf16.gmra.mrb[24].mxu1 %v414_v10 }
 0x1bb   :  { %v835_v13 = vpop.f32.mrb[32].mxu0 }
 0x1bc   :  { %v529_v14 = vadd.f32 %v835_v13, %v1101_v12  ;;  %v520_v15 = vpop.f32.mrb[33].mxu0 }
 0x1bd   :  { %v521_v16 = vadd.f32 %v1101_v12, %v520_v15  ;;  %v836_v26 = vpop.f32.mrb[34].mxu0 }
 0x1be   :  { %649 = vst [vmem:[#allocation2 + $0x10] sm:$0xff] %v529_v14  ;;  %v532_v17 = vadd.f32 %v836_v26, %v1101_v12  ;;  %v523_v18 = vpop.f32.mrb[35].mxu0 }
 0x1bf   :  { %647 = vst [vmem:[#allocation2] sm:$0xff] %v521_v16  ;;  %v524_v19 = vadd.f32 %v1101_v12, %v523_v18 }
 0x1c0   :  { %650 = vst [vmem:[#allocation2 + $0x18] sm:$0xff] %v532_v17 }
 0x1c1   :  { %648 = vst [vmem:[#allocation2 + $0x8] sm:$0xff] %v524_v19 }
 0x1c3   :  { %v839_v20 = vpop.f32.mrb[0].mxu1 }
 0x1c4   :  { %v545_v21 = vadd.f32 %v839_v20, %v1101_v12  ;;  %v536_v22 = vpop.f32.mrb[1].mxu1 }
 0x1c5   :  { %v537_v23 = vadd.f32 %v1101_v12, %v536_v22  ;;  %v840_v24 = vpop.f32.mrb[2].mxu1 }
 0x1c6   :  { %653 = vst [vmem:[#allocation2 + $0x30] sm:$0xff] %v545_v21  ;;  %v548_v25 = vadd.f32 %v840_v24, %v1101_v12  ;;  %v539_v27 = vpop.f32.mrb[3].mxu1 }
 0x1c7   :  { %651 = vst [vmem:[#allocation2 + $0x20] sm:$0xff] %v537_v23  ;;  %v540_v28 = vadd.f32 %v1101_v12, %v539_v27 }
 0x1c8   :  { %654 = vst [vmem:[#allocation2 + $0x38] sm:$0xff] %v548_v25 }
 0x1c9   :  { %652 = vst [vmem:[#allocation2 + $0x28] sm:$0xff] %v540_v28 }
 0x1cb   :  { %v843_v29 = vpop.f32.mrb[4].mxu1 }
 0x1cc   :  { %v561_v30 = vadd.f32 %v843_v29, %v1101_v12  ;;  %v552_v31 = vpop.f32.mrb[5].mxu1 }
 0x1cd   :  { %v553_v32 = vadd.f32 %v1101_v12, %v552_v31  ;;  %v844_v33 = vpop.f32.mrb[6].mxu1 }
 0x1ce   :  { %657 = vst [vmem:[#allocation2 + $0x50] sm:$0xff] %v561_v30  ;;  %v564_v34 = vadd.f32 %v844_v33, %v1101_v12  ;;  %v555_v35 = vpop.f32.mrb[7].mxu1 }
 0x1cf   :  { %655 = vst [vmem:[#allocation2 + $0x40] sm:$0xff] %v553_v32  ;;  %v556_v36 = vadd.f32 %v1101_v12, %v555_v35 }
 0x1d0   :  { %658 = vst [vmem:[#allocation2 + $0x58] sm:$0xff] %v564_v34 }
 0x1d1   :  { %656 = vst [vmem:[#allocation2 + $0x48] sm:$0xff] %v556_v36 }
 0x1d3   :  { %v847_v37 = vpop.f32.mrb[8].mxu1 }
 0x1d4   :  { %v577_v38 = vadd.f32 %v847_v37, %v1101_v12  ;;  %v568_v39 = vpop.f32.mrb[9].mxu1 }
 0x1d5   :  { %v569_v40 = vadd.f32 %v1101_v12, %v568_v39  ;;  %v848_v41 = vpop.f32.mrb[10].mxu1 }
 0x1d6   :  { %661 = vst [vmem:[#allocation2 + $0x70] sm:$0xff] %v577_v38  ;;  %v580_v42 = vadd.f32 %v848_v41, %v1101_v12  ;;  %v571_v43 = vpop.f32.mrb[11].mxu1 }
 0x1d7   :  { %659 = vst [vmem:[#allocation2 + $0x60] sm:$0xff] %v569_v40  ;;  %v572_v44 = vadd.f32 %v1101_v12, %v571_v43 }
 0x1d8   :  { %662 = vst [vmem:[#allocation2 + $0x78] sm:$0xff] %v580_v42 }
 0x1d9   :  { %660 = vst [vmem:[#allocation2 + $0x68] sm:$0xff] %v572_v44 }
 0x1db   :  { %v851_v45 = vpop.f32.mrb[12].mxu1 }
 0x1dc   :  { %v593_v46 = vadd.f32 %v851_v45, %v1101_v12  ;;  %v584_v47 = vpop.f32.mrb[13].mxu1 }
 0x1dd   :  { %v585_v48 = vadd.f32 %v1101_v12, %v584_v47  ;;  %v852_v49 = vpop.f32.mrb[14].mxu1 }
 0x1de   :  { %665 = vst [vmem:[#allocation2 + $0x90] sm:$0xff] %v593_v46  ;;  %v596_v50 = vadd.f32 %v852_v49, %v1101_v12  ;;  %v587_v51 = vpop.f32.mrb[15].mxu1 }
 0x1df   :  { %663 = vst [vmem:[#allocation2 + $0x80] sm:$0xff] %v585_v48  ;;  %v588_v52 = vadd.f32 %v1101_v12, %v587_v51 }
 0x1e0   :  { %666 = vst [vmem:[#allocation2 + $0x98] sm:$0xff] %v596_v50 }
 0x1e1   :  { %664 = vst [vmem:[#allocation2 + $0x88] sm:$0xff] %v588_v52 }
 0x1e3   :  { %v855_v53 = vpop.f32.mrb[16].mxu1 }
 0x1e4   :  { %v609_v54 = vadd.f32 %v855_v53, %v1101_v12  ;;  %v600_v55 = vpop.f32.mrb[17].mxu1 }
 0x1e5   :  { %v601_v56 = vadd.f32 %v1101_v12, %v600_v55  ;;  %v856_v57 = vpop.f32.mrb[18].mxu1 }
 0x1e6   :  { %669 = vst [vmem:[#allocation2 + $0xb0] sm:$0xff] %v609_v54  ;;  %v612_v58 = vadd.f32 %v856_v57, %v1101_v12  ;;  %v603_v59 = vpop.f32.mrb[19].mxu1 }
 0x1e7   :  { %667 = vst [vmem:[#allocation2 + $0xa0] sm:$0xff] %v601_v56  ;;  %v604_v60 = vadd.f32 %v1101_v12, %v603_v59 }
 0x1e8   :  { %670 = vst [vmem:[#allocation2 + $0xb8] sm:$0xff] %v612_v58 }
 0x1e9   :  { %668 = vst [vmem:[#allocation2 + $0xa8] sm:$0xff] %v604_v60 }
 0x1eb   :  { %v859_v61 = vpop.f32.mrb[20].mxu1 }
 0x1ec   :  { %v625_v62 = vadd.f32 %v859_v61, %v1101_v12  ;;  %v616_v63 = vpop.f32.mrb[21].mxu1 }
 0x1ed   :  { %v617_v0 = vadd.f32 %v1101_v12, %v616_v63  ;;  %v860_v1 = vpop.f32.mrb[22].mxu1 }
 0x1ee   :  { %673 = vst [vmem:[#allocation2 + $0xd0] sm:$0xff] %v625_v62  ;;  %v628_v2 = vadd.f32 %v860_v1, %v1101_v12  ;;  %v619_v3 = vpop.f32.mrb[23].mxu1 }
 0x1ef   :  { %671 = vst [vmem:[#allocation2 + $0xc0] sm:$0xff] %v617_v0  ;;  %v620_v4 = vadd.f32 %v1101_v12, %v619_v3 }
 0x1f0   :  { %674 = vst [vmem:[#allocation2 + $0xd8] sm:$0xff] %v628_v2 }
 0x1f1   :  { %672 = vst [vmem:[#allocation2 + $0xc8] sm:$0xff] %v620_v4 }
 0x1f3   :  { %v863_v5 = vpop.f32.mrb[24].mxu1 }
 0x1f4   :  { %v641_v6 = vadd.f32 %v863_v5, %v1101_v12  ;;  %v632_v7 = vpop.f32.mrb[25].mxu1 }
 0x1f5   :  { %v633_v8 = vadd.f32 %v1101_v12, %v632_v7  ;;  %v864_v9 = vpop.f32.mrb[26].mxu1 }
 0x1f6   :  { %677 = vst [vmem:[#allocation2 + $0xf0] sm:$0xff] %v641_v6  ;;  %v644_v10 = vadd.f32 %v864_v9, %v1101_v12  ;;  %v635_v11 = vpop.f32.mrb[27].mxu1 }
 0x1f7   :  { %675 = vst [vmem:[#allocation2 + $0xe0] sm:$0xff] %v633_v8  ;;  %v636_v13 = vadd.f32 %v1101_v12, %v635_v11 }
 0x1f8   :  { %678 = vst [vmem:[#allocation2 + $0xf8] sm:$0xff] %v644_v10 }
 0x1f9   :  { %676 = vst [vmem:[#allocation2 + $0xe8] sm:$0xff] %v636_v13 }
 0x1fa   :  { %921 = shalt.err (!%p918_p4)
}
 0x1fb   :  { %s922_s23 = scalar_lea.hbm %s1152_s5, 4096 }
 0x1fc   :  { %p923_p5 = scmp.ne.s32.totalorder %s1152_s5, %s922_s23  ;;  %p926_p6 = scmp.lt.u32.totalorder %s922_s23, %s1152_s5 }
 0x1fe   :  { %p928_p7 = pnand %p926_p6, %p923_p5 }
 0x200   :  { %931 = shalt.err (!%p928_p7)
}
 0x201   :  { %s935_s1 = smov 128   ;;  %s936_s28 = smov 8  }
 0x202   :  { %690 = dma.vmem_to_hbm [thread:$0]  %s685_s19, 4096, %s1152_s5, [#allocation3], %s935_s1, %s935_s1, %s936_s28  }
 0x203   :  { %932 = dma.done.wait [#allocation3], 4096  }
 0x204   :  { %933 = vsyncadd [#allocation3], 4294963200 }
 0x205   :  { %694 = vsyncpa [#allocation3], 1 }

</bundles_post_ra>
